<compile_context>
chip_gen: v7x
topology: tpu7x:2x2x1
jax: 0.10.0
libtpu: 0.0.40
codegen_flags: <defaults>
</compile_context>

<pallas_src>
import functools

import jax
import jax.numpy as jnp
from jax.experimental import pallas as pl
from jax.experimental.pallas import tpu as pltpu


def _cdiv(a, b):
    return -(-a // b)


def _vmem_capacity_bytes():
    try:
        return int(pltpu.get_tpu_info().vmem_capacity_bytes)
    except Exception:
        return 64 * 1024 * 1024  # conservative fallback (v7x per-TC VMEM)


def _vmem_limit_bytes():
    # Raise the scoped limit explicitly, leaving headroom for double buffering.
    return _vmem_capacity_bytes() // 2


def _pick_tile(n_slices, per_slice_bytes, other_grid_steps=1):
    """Slices per grid step: keep double-buffered (in + out) blocks well inside
    the scoped VMEM limit; keep >= 2 total grid steps for v7x's 2 TCs."""
    budget = _vmem_capacity_bytes() // 8  # ~16 MiB on v5e/v6e, ~8 MiB on v7x
    t = max(1, budget // max(1, 2 * per_slice_bytes))
    t = min(t, n_slices, 1024)
    if n_slices > 1 and other_grid_steps * _cdiv(n_slices, t) < 2:
        t = _cdiv(n_slices, 2)
    return int(t)


def _write_padded(x, o_ref, h, w, H, W, Wp):
    """x: (T, H, W) -> o_ref: (T, H+2h, W+2w). Circular pad W, zero pad H.
    Direct region stores; no concatenates / intermediate buffers."""
    if h > 0:
        band = jnp.zeros((o_ref.shape[0], h, Wp), o_ref.dtype)
        o_ref[:, :h, :] = band            # top zero rows (incl. corners)
        o_ref[:, h + H:, :] = band        # bottom zero rows (incl. corners)
    o_ref[:, h:h + H, w:w + W] = x        # interior
    if w > 0:
        o_ref[:, h:h + H, :w] = x[:, :, W - w:]   # left wrap columns
        o_ref[:, h:h + H, w + W:] = x[:, :, :w]   # right wrap columns


@functools.lru_cache(maxsize=None)
def _make_lrpad2d_call(n_slices, H, W, h, w, dtype, t_slices):
    """Pads (n_slices, H, W) -> (n_slices, H+2h, W+2w), T slices per step."""
    Hp, Wp = H + 2 * h, W + 2 * w
    T = t_slices

    def kernel(x_ref, o_ref):
        _write_padded(x_ref[...], o_ref, h, w, H, W, Wp)

    return pl.pallas_call(
        kernel,
        out_shape=jax.ShapeDtypeStruct((n_slices, Hp, Wp), dtype),
        grid_spec=pltpu.PrefetchScalarGridSpec(
            num_scalar_prefetch=0,
            grid=(_cdiv(n_slices, T),),
            in_specs=[pl.BlockSpec((T, H, W), lambda i: (i, 0, 0))],
            out_specs=pl.BlockSpec((T, Hp, Wp), lambda i: (i, 0, 0)),
        ),
        compiler_params=pltpu.CompilerParams(
            dimension_semantics=("parallel",),
            vmem_limit_bytes=_vmem_limit_bytes(),
        ),
    )


@functools.lru_cache(maxsize=None)
def _make_lrpad3d_call(n_bc, D, H, W, d, dtype, t_bc):
    """Pads (n_bc, D, H, W) -> (n_bc, D+2d, H+2d, W+2d).  Depth zero-pad is
    folded into the grid: rim depth slices write zeros and never consume the
    (clamped) input block."""
    Hp, Wp, Dp = H + 2 * d, W + 2 * d, D + 2 * d
    T = t_bc

    def in_map(i, z):
        # Clamp into [0, D): rim steps never read the block, and an unchanged
        # block index lets Pallas skip re-fetching it.
        return (i, jnp.clip(z - d, 0, D - 1), 0, 0)

    def out_map(i, z):
        return (i, z, 0, 0)

    def kernel(x_ref, o_ref):
        z = pl.program_id(1)
        rim = jnp.logical_or(z < d, z >= D + d)

        @pl.when(rim)
        def _():
            o_ref[...] = jnp.zeros(o_ref.shape, o_ref.dtype)

        @pl.when(jnp.logical_not(rim))
        def _():
            _write_padded(x_ref[...], o_ref, d, d, H, W, Wp)

    return pl.pallas_call(
        kernel,
        out_shape=jax.ShapeDtypeStruct((n_bc, Dp, Hp, Wp), dtype),
        grid_spec=pltpu.PrefetchScalarGridSpec(
            num_scalar_prefetch=0,
            grid=(_cdiv(n_bc, T), Dp),
            in_specs=[pl.BlockSpec((T, None, H, W), in_map)],
            out_specs=pl.BlockSpec((T, None, Hp, Wp), out_map),
        ),
        compiler_params=pltpu.CompilerParams(
            dimension_semantics=("parallel", "parallel"),
            vmem_limit_bytes=_vmem_limit_bytes(),
        ),
    )


def lrpad_2d(x, padding):
    """x: (B, C, H, W). Circular pad W by w, zero pad H by h."""
    if isinstance(padding, int):
        h = w = padding
    else:
        h, w = padding[0], padding[1]
    B, C, H, W = x.shape
    assert H % 2 == 0 and W % 2 == 0
    if h == 0 and w == 0:
        return x
    assert w <= W  # circular pad requires pad width <= W
    Hp, Wp = H + 2 * h, W + 2 * w
    n = B * C
    per_slice = (H * W + Hp * Wp) * x.dtype.itemsize
    T = _pick_tile(n, per_slice)
    call = _make_lrpad2d_call(n, H, W, h, w, x.dtype, T)
    return call(x.reshape(n, H, W)).reshape(B, C, Hp, Wp)


def lrpad_3d(x, padding):
    """x: (B, C, D, H, W). Zero pad D, circular pad W, zero pad H, all by d."""
    if isinstance(padding, int):
        h = w = padding
    else:
        h, w = padding[0], padding[1]
    assert h == w
    d = h
    B, C, D, H, W = x.shape
    assert H % 2 == 0 and W % 2 == 0
    if d == 0:
        return x  # degenerate case: nothing to pad
    assert d <= W
    Hp, Wp, Dp = H + 2 * d, W + 2 * d, D + 2 * d
    n_bc = B * C
    per_slice = (H * W + Hp * Wp) * x.dtype.itemsize
    T = _pick_tile(n_bc, per_slice, other_grid_steps=Dp)
    call = _make_lrpad3d_call(n_bc, D, H, W, d, x.dtype, T)
    return call(x.reshape(n_bc, D, H, W)).reshape(B, C, Dp, Hp, Wp)


def lrpad(x, padding):
    if x.ndim == 4:
        return lrpad_2d(x, padding)
    elif x.ndim == 5:
        return lrpad_3d(x, padding)
    raise ValueError("LRPad expects a 4-D or 5-D input")


# -------------------- pure-JAX references (for testing) --------------------
def _ref_2d(x, h, w):
    y = jnp.pad(x, ((0, 0), (0, 0), (0, 0), (w, w)), mode="wrap")
    return jnp.pad(y, ((0, 0), (0, 0), (h, h), (0, 0)), mode="constant")


def _ref_3d(x, d):
    B, C, D, H, W = x.shape
    zeros = jnp.zeros((B, C, d, H, W), dtype=x.dtype)
    xp = jnp.concatenate([zeros, x, zeros], axis=2)
    xp = xp.reshape(B, C * (D + 2 * d), H, W)
    y = _ref_2d(xp, d, d)
    return y.reshape(B, C, D + 2 * d, H + 2 * d, W + 2 * d)


if __name__ == "__main__":
    key = jax.random.PRNGKey(0)
    k2, k3 = jax.random.split(key)

    # 2-D case: (B, C, H, W) = (2, 4, 16, 16), padding = (2, 3)
    x2 = jax.random.normal(k2, (2, 4, 16, 16), dtype=jnp.float32)
    y2 = jax.block_until_ready(lrpad(x2, (2, 3)))
    assert y2.shape == (2, 4, 20, 22)
    assert jnp.allclose(y2, _ref_2d(x2, 2, 3))

    # 3-D case: (B, C, D, H, W) = (2, 3, 4, 8, 8), padding = 2
    x3 = jax.random.normal(k3, (2, 3, 4, 8, 8), dtype=jnp.float32)
    y3 = jax.block_until_ready(lrpad(x3, 2))
    assert y3.shape == (2, 3, 8, 12, 12)
    assert jnp.allclose(y3, _ref_3d(x3, 2))

    print("KERNEL_OK")
</pallas_src>

<mosaic_0001>
module attributes {stable_mosaic.version = 11 : i64} {
  func.func @kernel(%arg0: i32, %arg1: memref<4x16x16xf32, #tpu.memory_space<vmem>>, %arg2: memref<4x20x22xf32, #tpu.memory_space<vmem>>) attributes {dimension_semantics = [#tpu.dimension_semantics<parallel>], iteration_bounds = array<i64: 2>, scalar_prefetch = 0 : i64, scratch_operands = 0 : i64, tpu.core_type = #tpu.core_type<tc>, window_params = [{transform_indices = @transform_0, window_bounds = array<i64: 4, 16, 16>}, {transform_indices = @transform_1, window_bounds = array<i64: 4, 20, 22>}]} {
    %c0 = arith.constant 0 : index
    %c0_0 = arith.constant 0 : index
    %c0_1 = arith.constant 0 : index
    %0 = vector.load %arg1[%c0, %c0_0, %c0_1] : memref<4x16x16xf32, #tpu.memory_space<vmem>>, vector<4x16x16xf32>
    %cst = arith.constant 0.000000e+00 : f32
    %1 = vector.broadcast %cst : f32 to vector<4x2x22xf32>
    %c0_2 = arith.constant 0 : index
    %c0_3 = arith.constant 0 : index
    %c0_4 = arith.constant 0 : index
    %2 = vector.load %arg2[%c0_2, %c0_3, %c0_4] : memref<4x20x22xf32, #tpu.memory_space<vmem>>, vector<4x2x22xf32>
    tpu.vector_store %arg2[%c0_2, %c0_3, %c0_4], %1 {strides = array<i32>} : memref<4x20x22xf32, #tpu.memory_space<vmem>>, vector<4x2x22xf32>,
    %c0_5 = arith.constant 0 : index
    %c18 = arith.constant 18 : index
    %c0_6 = arith.constant 0 : index
    %3 = vector.load %arg2[%c0_5, %c18, %c0_6] : memref<4x20x22xf32, #tpu.memory_space<vmem>>, vector<4x2x22xf32>
    tpu.vector_store %arg2[%c0_5, %c18, %c0_6], %1 {strides = array<i32>} : memref<4x20x22xf32, #tpu.memory_space<vmem>>, vector<4x2x22xf32>,
    %c0_7 = arith.constant 0 : index
    %c2 = arith.constant 2 : index
    %c3 = arith.constant 3 : index
    %4 = vector.load %arg2[%c0_7, %c2, %c3] : memref<4x20x22xf32, #tpu.memory_space<vmem>>, vector<4x16x16xf32>
    tpu.vector_store %arg2[%c0_7, %c2, %c3], %0 {strides = array<i32>} : memref<4x20x22xf32, #tpu.memory_space<vmem>>, vector<4x16x16xf32>,
    %5 = vector.extract_strided_slice %0 {offsets = [0, 0, 13], sizes = [4, 16, 3], strides = [1, 1, 1]} : vector<4x16x16xf32> to vector<4x16x3xf32>
    %c0_8 = arith.constant 0 : index
    %c2_9 = arith.constant 2 : index
    %c0_10 = arith.constant 0 : index
    %6 = vector.load %arg2[%c0_8, %c2_9, %c0_10] : memref<4x20x22xf32, #tpu.memory_space<vmem>>, vector<4x16x3xf32>
    tpu.vector_store %arg2[%c0_8, %c2_9, %c0_10], %5 {strides = array<i32>} : memref<4x20x22xf32, #tpu.memory_space<vmem>>, vector<4x16x3xf32>,
    %7 = vector.extract_strided_slice %0 {offsets = [0, 0, 0], sizes = [4, 16, 3], strides = [1, 1, 1]} : vector<4x16x16xf32> to vector<4x16x3xf32>
    %c0_11 = arith.constant 0 : index
    %c2_12 = arith.constant 2 : index
    %c19 = arith.constant 19 : index
    %8 = vector.load %arg2[%c0_11, %c2_12, %c19] : memref<4x20x22xf32, #tpu.memory_space<vmem>>, vector<4x16x3xf32>
    tpu.vector_store %arg2[%c0_11, %c2_12, %c19], %7 {strides = array<i32>} : memref<4x20x22xf32, #tpu.memory_space<vmem>>, vector<4x16x3xf32>,
    return
  }
  func.func @transform_0(%arg0: i32) -> (i32, i32, i32) {
    %c0_i32 = arith.constant 0 : i32
    %c0_i32_0 = arith.constant 0 : i32
    %c0_i32_1 = arith.constant 0 : i32
    return %arg0, %c0_i32, %c0_i32_0 : i32, i32, i32
  }
  func.func @transform_1(%arg0: i32) -> (i32, i32, i32) {
    %c0_i32 = arith.constant 0 : i32
    %c0_i32_0 = arith.constant 0 : i32
    %c0_i32_1 = arith.constant 0 : i32
    return %arg0, %c0_i32, %c0_i32_0 : i32, i32, i32
  }
}

</mosaic_0001>

<bundles_post_ra>
// kernel: tpu_custom_call.1
= control target key start
LH: loop header
LB: loop body
LE: loop exit
PB: predicated region body
PF: predicated region fallthrough
CT: control target
= control target key end

     0   :  { %6 = vsyncpa [#allocation3], 0  ;;  %s663_s0 = inlined_call_operand.hbm [shape: f32[8,16,16], index: 0, kind: input, shape index: {}]   ;;  %s664_s1 = inlined_call_operand.vmem [shape: f32[8,20,22], index: 1, kind: output, shape index: {}]  }
   0x1   :  { %8 = vsyncpa [#allocation3 + $0x1], 0  ;;  %s480_s6 = smov 0   ;;  %s482_s7 = smov 0  }
   0x2   :  { %s484_s8 = smov 0   ;;  %s486_s9 = smov 0  }
   0x3 LB: > { %s335_s10 = sadd.s32 4294967295, %s461_s9   ;;  %s500_s11 = sadd.s32 1, %s461_s9   ;;  %s461_s9 = sphi %s486_s9, %s671_s9   ;;  %s457_s8 = sphi %s484_s8, %s670_s8   ;;  %s453_s7 = sphi %s482_s7, %s669_s7   ;;  %s449_s6 = sphi %s480_s6, %s668_s6  }
   0x4   : > { %s18_s12 = ssub.s32 %s461_s9, %s500_s11  ;;  %s21_s13 = sadd.s32 1, %s457_s8 }
   0x5   : > { %p19_p0 = scmp.eq.s32.totalorder %s18_s12, 0  ;;  %p28_p1 = scmp.ne.s32.totalorder %s457_s8, %s453_s7 }
   0x6   : > { %p29_p2 = scmp.eq.s32.totalorder %s461_s9, 0  ;;  %p34_p3 = scmp.ne.s32.totalorder %s453_s7, %s449_s6 }
   0x7   : > { %s510_s14 = scalar_select %p19_p0, %s457_s8, %s21_s13  }
   0x8   : > { %p30_p4 = por %p29_p2, %p28_p1  ;;  %p35_p5 = scmp.eq.s32.totalorder %s335_s10, 0 }
   0x9   : > { %p358_p6 = scmp.lt.s32.totalorder %s461_s9, 2  ;;  %s84_s16 = sand.u32 1, %s457_s8  }
   0xa   : > { %p515_p7 = por %p35_p5, %p34_p3  ;;  %s339_s17 = sshll.u32 %s84_s16, 6 }
   0xb   : > { %s350_s18 = sshll.u32 %s461_s9, 10  ;;  %s88_s22 = scalar_lea.vmem [#allocation2], %s339_s17 }
   0xc   : > { %s524_s21 = scalar_lea.hbm %s663_s0, %s350_s18  ;;  %s96_s23 = sshll.u32 %s88_s22, 4  ;;  %s526_s23 = int_to_ptr.vmem [resolvable:$true] %s96_s23 }
   0xd   : > { %p528_p8 = pnand %p358_p6, %p30_p4  ;;  %s533_s25 = scalar_lea.sflag [#allocation3], %s84_s16 }
   0xe   : > { %s397_s26 = scalar_lea.hbm %s524_s21, 1024  ;;  %s402_s29 = scalar_lea.hbm %s663_s0, 2048 }
   0xf   : > { %p398_p10 = scmp.ne.s32.totalorder %s524_s21, %s397_s26  ;;  %p399_p11 = pneg %p528_p8 }
  0x10   : > { %p403_p0 = scmp.lt.u32.totalorder %s524_s21, %s663_s0  ;;  %p404_p1 = scmp.lt.u32.totalorder %s402_s29, %s397_s26 }
  0x11   : > { %p400_p12 = pnand %p399_p11, %p398_p10  ;;  %p406_p3 = scmp.lt.u32.totalorder %s397_s26, %s524_s21 }
  0x12   : > { %p405_p2 = por %p404_p1, %p403_p0 }
  0x13   : > { %p401_p13 = pneg %p400_p12 }
  0x14   : > { %p407_p4 = por %p406_p3, %p405_p2 }
  0x16   : > { %p408_p5 = pnand %p407_p4, %p401_p13 }
  0x18   : > { %411 = shalt.err (!%p408_p5)
}
  0x19   : > { %s412_s3 = scalar_lea.vmem %s526_s23, 1024  ;;  %s463_s4 = smov [#allocation2]  }
  0x1a   : > { %p413_p6 = scmp.ne.s32.totalorder %s526_s23, %s412_s3  ;;  %s417_s5 = sshll.u32 %s463_s4, 4  ;;  %s418_s5 = int_to_ptr.vmem [resolvable:$false] %s417_s5 }
  0x1b   : > { %s419_s6 = scalar_lea.vmem %s418_s5, 2048  ;;  %p420_p9 = scmp.lt.s32.totalorder %s526_s23, %s418_s5 }
  0x1c   : > { %p415_p10 = pnand %p413_p6, %p399_p11  ;;  %p421_p0 = scmp.lt.s32.totalorder %s419_s6, %s412_s3 }
  0x1e   : > { %p416_p12 = pneg %p415_p10  ;;  %p422_p1 = por %p421_p0, %p420_p9 }
  0x20   : > { %p423_p2 = pnand %p422_p1, %p416_p12 }
  0x22   : > { %426 = shalt.err (!%p423_p2)
}
  0x23   : > { %s464_s12 = smov 128   ;;  %s465_s13 = smov 8  }
  0x24   : > { %357 = dma.hbm_to_vmem [thread:$0]  (!%p528_p8), %s524_s21, 1024, %s526_s23, %s533_s25, %s464_s12, %s464_s12, %s465_s13  }
  0x25   : > { %p104_p11 = scmp.lt.s32.totalorder %s461_s9, 3  ;;  %p667_p13 = scmp.ge.s32.totalorder %s461_s9, 1 }
  0x27   : > { %p105_p3 = pnand %p667_p13, %p104_p11 }
  0x28   : > { %s110_s16 = sand.u32 (!%p105_p3), 1, %s453_s7  }
  0x29   : > { %108 = sbr.rel (%p105_p3) target bundleno = 211 (0xd3), region = 24  ;;  %s344_s17 = sshll.u32 (!%p105_p3), %s110_s16, 6 }
  0x2a   : > { %s111_s18 = scalar_lea.sflag (!%p105_p3), [#allocation3], %s110_s16  ;;  %s565_s19 = scalar_lea.vmem (!%p105_p3), [#allocation2], %s344_s17 }
  0x30   : > { %444 = dma.done.wait (%p515_p7), %s111_s18, 1024  }
  0x31   : > { %446 = vsyncadd (%p515_p7), %s111_s18, 4294966272  ;;  %s345_s20 = sshll.u32 %s335_s10, 2  ;;  %vm150_vm0 = vcmask 173056   ;;  %v144_v0 = vld [vmem:[%s565_s19 + $0x10] sm:$0xff]  ;;  %v142_v1 = vld [vmem:[%s565_s19] sm:$0xff]  ;;  %v466_v2 = vmov 0.0  }
  0x32   : > { %p136_p8 = scmp.lt.s32.totalorder %s345_s20, 7  ;;  %s467_s9 = smov 3   ;;  %v145_v3 = vld [vmem:[%s565_s19 + $0x18] sm:$0xff]  ;;  %v143_v4 = vld [vmem:[%s565_s19 + $0x8] sm:$0xff]  ;;  %v146_v6 = vld [vmem:[%s565_s19 + $0x20] sm:$0xff]  ;;  %vm191_vm1 = vcmask 154648  }
  0x33   : > { %171 = vrot.lane.b32.xlu1 %v144_v0, %s467_s9  ;;  %167 = vrot.lane.b32.xlu0 %v142_v1, %s467_s9  ;;  %v147_v5 = vld [vmem:[%s565_s19 + $0x28] sm:$0xff]  ;;  %v149_v7 = vld [vmem:[%s565_s19 + $0x38] sm:$0xff]  ;;  %s468_s10 = smov 115   ;;  %s469_s15 = smov 19   ;;  %vm224_vm2 = vcmask 23552   ;;  %vm257_vm3 = vcmask 179352  }
  0x34   : > { %s673_s20 = smov (!%p136_p8, %s345_s20), 7  ;;  %v148_v8 = vld [vmem:[%s565_s19 + $0x30] sm:$0xff] }
  0x35   : > { %s351_s21 = smul.u32 24, %s673_s20 }
  0x37   : > { %s576_s24 = scalar_lea.vmem %s664_s1, %s351_s21  ;;  %173 = vrot.lane.b32.xlu1 %v145_v3, %s467_s9  ;;  %169 = vrot.lane.b32.xlu0 %v143_v4, %s467_s9 }
  0x38   : > { %151 = vst.msk [vmem:[%s576_s24] sm:$0x3] %vm150_vm0, %v466_v2  ;;  %155 = vst.msk [vmem:[%s576_s24 + $0x12] sm:$0x3] %vm150_vm0, %v466_v2 }
  0x39   : > { %152 = vst.msk [vmem:[%s576_s24 + $0x18] sm:$0x3] %vm150_vm0, %v466_v2  ;;  %156 = vst.msk [vmem:[%s576_s24 + $0x2a] sm:$0x3] %vm150_vm0, %v466_v2 }
  0x3a   : > { %153 = vst.msk [vmem:[%s576_s24 + $0x30] sm:$0x3] %vm150_vm0, %v466_v2  ;;  %157 = vst.msk [vmem:[%s576_s24 + $0x42] sm:$0x3] %vm150_vm0, %v466_v2 }
  0x3b   : > { %154 = vst.msk [vmem:[%s576_s24 + $0x48] sm:$0x3] %vm150_vm0, %v466_v2  ;;  %158 = vst.msk [vmem:[%s576_s24 + $0x5a] sm:$0x3] %vm150_vm0, %v466_v2  ;;  %177 = vrot.lane.b32.xlu1 %v147_v5, %s467_s9  ;;  %175 = vrot.lane.b32.xlu0 %v146_v6, %s467_s9 }
  0x3f   : > { %181 = vrot.lane.b32.xlu1 %v149_v7, %s467_s9  ;;  %179 = vrot.lane.b32.xlu0 %v148_v8, %s467_s9 }
  0x43   : > { %202 = vrot.lane.b32.xlu1 %v143_v4, %s468_s10  ;;  %200 = vrot.lane.b32.xlu0 %v142_v1, %s468_s10 }
  0x47   : > { %206 = vrot.lane.b32.xlu1 %v145_v3, %s468_s10  ;;  %204 = vrot.lane.b32.xlu0 %v144_v0, %s468_s10 }
  0x4b   : > { %210 = vrot.lane.b32.xlu1 %v147_v5, %s468_s10  ;;  %208 = vrot.lane.b32.xlu0 %v146_v6, %s468_s10 }
  0x4f   : > { %214 = vrot.lane.b32.xlu1 %v149_v7, %s468_s10  ;;  %212 = vrot.lane.b32.xlu0 %v148_v8, %s468_s10 }
  0x53   : > { %235 = vrot.lane.b32.xlu1 %v143_v4, %s469_s15  ;;  %233 = vrot.lane.b32.xlu0 %v142_v1, %s469_s15 }
  0x57   : > { %239 = vrot.lane.b32.xlu1 %v145_v3, %s469_s15  ;;  %237 = vrot.lane.b32.xlu0 %v144_v0, %s469_s15 }
  0x5b   : > { %243 = vrot.lane.b32.xlu1 %v147_v5, %s469_s15  ;;  %241 = vrot.lane.b32.xlu0 %v146_v6, %s469_s15 }
  0x5f   : > { %247 = vrot.lane.b32.xlu1 %v149_v7, %s469_s15  ;;  %245 = vrot.lane.b32.xlu0 %v148_v8, %s469_s15 }
  0xa5   : > { %v172_v9 = vpop.permute.xlu1 %171  ;;  %v168_v10 = vpop.permute.xlu0 %167 }
  0xa6   : > { %192 = vst.msk [vmem:[%s576_s24 + $0x2] sm:$0xff] %vm191_vm1, %v168_v10  ;;  %194 = vst.msk [vmem:[%s576_s24 + $0x1a] sm:$0xff] %vm191_vm1, %v172_v9 }
  0xa9   : > { %v174_v11 = vpop.permute.xlu1 %173  ;;  %v170_v12 = vpop.permute.xlu0 %169 }
  0xaa   : > { %193 = vst.msk [vmem:[%s576_s24 + $0xa] sm:$0xff] %vm191_vm1, %v170_v12  ;;  %195 = vst.msk [vmem:[%s576_s24 + $0x22] sm:$0xff] %vm191_vm1, %v174_v11 }
  0xad   : > { %v178_v13 = vpop.permute.xlu1 %177  ;;  %v176_v14 = vpop.permute.xlu0 %175 }
  0xae   : > { %197 = vst.msk [vmem:[%s576_s24 + $0x3a] sm:$0xff] %vm191_vm1, %v178_v13  ;;  %196 = vst.msk [vmem:[%s576_s24 + $0x32] sm:$0xff] %vm191_vm1, %v176_v14 }
  0xb1   : > { %v182_v15 = vpop.permute.xlu1 %181  ;;  %v180_v16 = vpop.permute.xlu0 %179 }
  0xb2   : > { %199 = vst.msk [vmem:[%s576_s24 + $0x52] sm:$0xff] %vm191_vm1, %v182_v15  ;;  %198 = vst.msk [vmem:[%s576_s24 + $0x4a] sm:$0xff] %vm191_vm1, %v180_v16 }
  0xb5   : > { %v203_v17 = vpop.permute.xlu1 %202  ;;  %v201_v18 = vpop.permute.xlu0 %200 }
  0xb6   : > { %226 = vst.msk [vmem:[%s576_s24 + $0xa] sm:$0xff] %vm224_vm2, %v203_v17  ;;  %225 = vst.msk [vmem:[%s576_s24 + $0x2] sm:$0xff] %vm224_vm2, %v201_v18 }
  0xb9   : > { %v207_v19 = vpop.permute.xlu1 %206  ;;  %v205_v20 = vpop.permute.xlu0 %204 }
  0xba   : > { %228 = vst.msk [vmem:[%s576_s24 + $0x22] sm:$0xff] %vm224_vm2, %v207_v19  ;;  %227 = vst.msk [vmem:[%s576_s24 + $0x1a] sm:$0xff] %vm224_vm2, %v205_v20 }
  0xbd   : > { %v211_v21 = vpop.permute.xlu1 %210  ;;  %v209_v22 = vpop.permute.xlu0 %208 }
  0xbe   : > { %230 = vst.msk [vmem:[%s576_s24 + $0x3a] sm:$0xff] %vm224_vm2, %v211_v21  ;;  %229 = vst.msk [vmem:[%s576_s24 + $0x32] sm:$0xff] %vm224_vm2, %v209_v22 }
  0xc1   : > { %v215_v23 = vpop.permute.xlu1 %214  ;;  %v213_v24 = vpop.permute.xlu0 %212 }
  0xc2   : > { %232 = vst.msk [vmem:[%s576_s24 + $0x52] sm:$0xff] %vm224_vm2, %v215_v23  ;;  %231 = vst.msk [vmem:[%s576_s24 + $0x4a] sm:$0xff] %vm224_vm2, %v213_v24 }
  0xc5   : > { %v236_v25 = vpop.permute.xlu1 %235  ;;  %v234_v26 = vpop.permute.xlu0 %233 }
  0xc6   : > { %259 = vst.msk [vmem:[%s576_s24 + $0xa] sm:$0xff] %vm257_vm3, %v236_v25  ;;  %258 = vst.msk [vmem:[%s576_s24 + $0x2] sm:$0xff] %vm257_vm3, %v234_v26 }
  0xc9   : > { %v240_v27 = vpop.permute.xlu1 %239  ;;  %v238_v28 = vpop.permute.xlu0 %237 }
  0xca   : > { %261 = vst.msk [vmem:[%s576_s24 + $0x22] sm:$0xff] %vm257_vm3, %v240_v27  ;;  %260 = vst.msk [vmem:[%s576_s24 + $0x1a] sm:$0xff] %vm257_vm3, %v238_v28 }
  0xcd   : > { %v244_v29 = vpop.permute.xlu1 %243  ;;  %v242_v30 = vpop.permute.xlu0 %241 }
  0xce   : > { %263 = vst.msk [vmem:[%s576_s24 + $0x3a] sm:$0xff] %vm257_vm3, %v244_v29  ;;  %262 = vst.msk [vmem:[%s576_s24 + $0x32] sm:$0xff] %vm257_vm3, %v242_v30 }
  0xd1   : > { %v248_v31 = vpop.permute.xlu1 %247  ;;  %v246_v32 = vpop.permute.xlu0 %245 }
  0xd2   : > { %265 = vst.msk [vmem:[%s576_s24 + $0x52] sm:$0xff] %vm257_vm3, %v248_v31  ;;  %264 = vst.msk [vmem:[%s576_s24 + $0x4a] sm:$0xff] %vm257_vm3, %v246_v32 }
  0xd3 PF: > { %p11_p7 = scmp.ge.s32.totalorder %s500_s11, 4   ;;  %s668_s6 = smov %s453_s7 }
  0xd4   : > { %s669_s7 = smov %s457_s8  ;;  %s670_s8 = smov %s510_s14 }
  0xd5   : > { %s671_s9 = smov %s500_s11  ;;  %13 = sbr.rel (!%p11_p7) target bundleno = 3 (0x3), region = 64 }
  0xdc   :  { %290 = vsyncpa [#allocation3], 1 }
  0xdd   :  { %292 = vsyncpa [#allocation3 + $0x1], 1 }

</bundles_post_ra>
